<compile_context>
chip_gen: v7x
topology: tpu7x:2x2x1
jax: 0.10.0
libtpu: 0.0.40
codegen_flags: <defaults>
</compile_context>

<pallas_src>
import functools

import jax
import jax.numpy as jnp
from jax.experimental import pallas as pl
from jax.experimental.pallas import tpu as pltpu

HIDDEN_SIZE = 64
LOG_STD_MIN = -20.0
LOG_STD_MAX = 2.0

LANE = 128          # lane width: every feature axis is padded to this inside the kernel
HPAD = 128          # padded hidden width (real hidden = 64, padding is zeros)
ALIGN = 16          # row alignment inside the bf16 slab (bf16 packs sublane pairs)
MAX_TB = 2048       # max batch-tile rows per grid step
MIN_CORE_SPLIT = 512  # batches >= 2*this are split into >=2 tiles (feed both v7x TCs)

# CORE_PARALLEL reliably shards grid steps across v7x's 2 TensorCores; on
# single-TC chips (v5e/v6e) it degenerates to a plain sequential grid.
_BATCH_DIM_SEMANTICS = getattr(pltpu, "CORE_PARALLEL", "parallel")


def _round_up(v, m):
    return (v + m - 1) // m * m


def _offsets(state_dim):
    """Row offsets of each packed tensor inside the parameter slab (16-row aligned)."""
    o = {}
    o["w1"] = 0
    o["b1"] = _round_up(state_dim, ALIGN)   # == padded state width
    o["w2"] = o["b1"] + ALIGN
    o["b2"] = o["w2"] + HPAD
    o["wh"] = o["b2"] + ALIGN
    o["bh"] = o["wh"] + HPAD
    o["mask"] = o["bh"] + ALIGN
    o["rows"] = o["mask"] + ALIGN
    return o


def pack_params(params):
    """Pack the 8 Linear tensors into one lane-padded [R, 128] bf16 slab.

    The mu / log_std head weights+biases are fused column-wise so the kernel
    does a single head matmul.  A 0/1 mu-lane mask row is also packed so the
    kernel never rebuilds an iota.  Call once per parameter update.
    """
    w1, b1, w2, b2, wmu, bmu, wls, bls = params
    S, H = w1.shape
    A = wmu.shape[1]
    o = _offsets(S)
    slab = jnp.zeros((o["rows"], LANE), jnp.float32)
    slab = slab.at[o["w1"]:o["w1"] + S, :H].set(w1)
    slab = slab.at[o["b1"], :H].set(b1.reshape(-1))
    slab = slab.at[o["w2"]:o["w2"] + H, :H].set(w2)
    slab = slab.at[o["b2"], :H].set(b2.reshape(-1))
    wh = jnp.concatenate([wmu, wls], axis=1)                     # (H, 2A) fused head
    bh = jnp.concatenate([bmu.reshape(-1), bls.reshape(-1)])     # (2A,)
    slab = slab.at[o["wh"]:o["wh"] + H, :2 * A].set(wh)
    slab = slab.at[o["bh"], :2 * A].set(bh)
    mask = (jnp.arange(LANE) < A).astype(jnp.float32)            # 1.0 on mu lanes
    slab = slab.at[o["mask"], :].set(mask)
    return slab.astype(jnp.bfloat16)


def _policy_kernel(x_ref, p_ref, out_ref, *, state_dim):
    o = _offsets(state_dim)
    s_pad = o["b1"]                                        # padded state width

    x = x_ref[...]                                         # (TB, Sp) bf16

    # Static, 16-row-aligned views into the packed bf16 parameter slab
    # (zero padding beyond the real extents keeps the padded lanes zero).
    w1 = p_ref[o["w1"]:o["w1"] + s_pad, :]                 # (Sp, 128)
    b1 = p_ref[o["b1"]:o["b1"] + 1, :]                     # (1, 128)
    w2 = p_ref[o["w2"]:o["w2"] + HPAD, :]                  # (128, 128)
    b2 = p_ref[o["b2"]:o["b2"] + 1, :]
    wh = p_ref[o["wh"]:o["wh"] + HPAD, :]                  # fused mu|log_std head
    bh = p_ref[o["bh"]:o["bh"] + 1, :]
    mu_mask = p_ref[o["mask"]:o["mask"] + 1, :]            # (1, 128) 1.0 on mu lanes

    # Single-pass bf16 MXU matmuls with f32 accumulation; ReLU on the VPU.
    h1 = jnp.maximum(jnp.dot(x, w1, preferred_element_type=jnp.float32) + b1, 0.0)
    h1 = h1.astype(jnp.bfloat16)
    h2 = jnp.maximum(jnp.dot(h1, w2, preferred_element_type=jnp.float32) + b2, 0.0)
    h2 = h2.astype(jnp.bfloat16)
    head = jnp.dot(h2, wh, preferred_element_type=jnp.float32) + bh   # (TB, 128) f32

    # clamp -> exp (exp runs on the EUP slot; clamp guarantees no overflow).
    std = jnp.exp(jnp.clip(head, LOG_STD_MIN, LOG_STD_MAX))
    # mu lanes carry the raw head, std lanes carry exp(clamped head).
    out_ref[...] = jnp.where(mu_mask > 0.5, head, std).astype(out_ref.dtype)


@functools.partial(jax.jit, static_argnames=("action_dim",))
def policy_forward(x, param_slab, action_dim):
    """Fused policy forward. Returns (mu, std), each [B, action_dim] float32."""
    B, S = x.shape
    Sp = _round_up(S, ALIGN)                   # padded feature width (matches slab w1 rows)

    # Balanced batch tiling: minimal padding waste, and >=2 tiles at large B so
    # both v7x TensorCores get work.
    ntiles = pl.cdiv(B, MAX_TB)
    if B >= 2 * MIN_CORE_SPLIT:
        ntiles = max(ntiles, 2)
    TB = _round_up(pl.cdiv(B, ntiles), ALIGN)
    Bp = _round_up(B, TB)

    x = x.astype(jnp.bfloat16)
    if Bp != B or Sp != S:
        x = jnp.pad(x, ((0, Bp - B), (0, Sp - S)))   # padded rows/cols computed & dropped
    grid = (Bp // TB,)

    cost = pl.CostEstimate(
        flops=2 * Bp * LANE * (Sp + HPAD + HPAD),
        transcendentals=Bp * LANE,
        bytes_accessed=(Bp * Sp + param_slab.size + Bp * LANE) * 2,   # everything bf16
    )

    # Constant-index parameter slab: fetched once -> single-buffer it.
    slab_spec_kwargs = {}
    if hasattr(pl, "Buffered"):
        slab_spec_kwargs["pipeline_mode"] = pl.Buffered(1)

    out = pl.pallas_call(
        functools.partial(_policy_kernel, state_dim=S),
        grid=grid,
        in_specs=[
            pl.BlockSpec((TB, Sp), lambda i: (i, 0)),             # batch-tiled activations
            pl.BlockSpec(param_slab.shape, lambda i: (0, 0),      # whole slab, VMEM-resident
                         **slab_spec_kwargs),
        ],
        out_specs=pl.BlockSpec((TB, LANE), lambda i: (i, 0)),     # lane-dense output slab
        out_shape=jax.ShapeDtypeStruct((Bp, LANE), jnp.bfloat16),
        compiler_params=pltpu.CompilerParams(
            dimension_semantics=(_BATCH_DIM_SEMANTICS,),
            vmem_limit_bytes=32 * 1024 * 1024),
        cost_estimate=cost,
    )(x, param_slab)

    mu = out[:B, :action_dim].astype(jnp.float32)
    std = out[:B, action_dim:2 * action_dim].astype(jnp.float32)
    return mu, std


def init_params(key, state_dim, action_dim):
    """Deterministic init mimicking nn.Linear default (U(-1/sqrt(fan_in), +))."""
    def linear(k, fan_in, fan_out):
        kw, kb = jax.random.split(k)
        bound = 1.0 / jnp.sqrt(fan_in)
        w = jax.random.uniform(kw, (fan_in, fan_out), jnp.float32, -bound, bound)
        b = jax.random.uniform(kb, (1, fan_out), jnp.float32, -bound, bound)
        return w, b

    k1, k2, k3, k4 = jax.random.split(key, 4)
    w1, b1 = linear(k1, state_dim, HIDDEN_SIZE)
    w2, b2 = linear(k2, HIDDEN_SIZE, HIDDEN_SIZE)
    wmu, bmu = linear(k3, HIDDEN_SIZE, action_dim)
    wls, bls = linear(k4, HIDDEN_SIZE, action_dim)
    return (w1, b1, w2, b2, wmu, bmu, wls, bls)


def policy_forward_ref(x, params):
    """Pure-JAX f32 reference for correctness check."""
    w1, b1, w2, b2, wmu, bmu, wls, bls = params
    h1 = jnp.maximum(x @ w1 + b1, 0.0)
    h2 = jnp.maximum(h1 @ w2 + b2, 0.0)
    mu = h2 @ wmu + bmu
    log_std = jnp.clip(h2 @ wls + bls, LOG_STD_MIN, LOG_STD_MAX)
    return mu, jnp.exp(log_std)


if __name__ == "__main__":
    # Small shapes consistent with a SAC policy (e.g. LunarLanderContinuous).
    BATCH = 4
    STATE_DIM = 8
    ACTION_DIM = 2

    key = jax.random.PRNGKey(0)
    k_params, k_x, k_x2 = jax.random.split(key, 3)
    params = init_params(k_params, STATE_DIM, ACTION_DIM)
    slab = jax.block_until_ready(pack_params(params))   # packed once, reused per call

    # bf16 MXU operands -> tolerances loosened vs. the f32 reference.
    TOL = dict(atol=5e-2, rtol=5e-2)

    # --- tiny batch (single grid step) ---
    x = jax.random.normal(k_x, (BATCH, STATE_DIM), jnp.float32)
    mu, std = policy_forward(x, slab, ACTION_DIM)
    jax.block_until_ready((mu, std))

    mu_ref, std_ref = policy_forward_ref(x, params)
    assert mu.shape == (BATCH, ACTION_DIM) and std.shape == (BATCH, ACTION_DIM)
    assert jnp.allclose(mu, mu_ref, **TOL)
    assert jnp.allclose(std, std_ref, **TOL)
    assert bool(jnp.all(std > 0.0))

    # --- larger ragged batch exercises balanced tiling + the 2-tile split path ---
    x2 = jax.random.normal(k_x2, (1200, STATE_DIM), jnp.float32)
    mu2, std2 = policy_forward(x2, slab, ACTION_DIM)
    jax.block_until_ready((mu2, std2))
    mu2_ref, std2_ref = policy_forward_ref(x2, params)
    assert jnp.allclose(mu2, mu2_ref, **TOL)
    assert jnp.allclose(std2, std2_ref, **TOL)

    # TODO(synk): PolicyNetwork.sample() uses torch.distributions.Normal.rsample
    # (stochastic); only the deterministic forward() is implemented as a kernel.
    print("KERNEL_OK")
</pallas_src>

<mosaic_0001>
module attributes {stable_mosaic.version = 11 : i64} {
  func.func @_policy_kernel(%arg0: i32, %arg1: memref<16x16xbf16, #tpu.memory_space<vmem>>, %arg2: memref<336x128xbf16, #tpu.memory_space<vmem>>, %arg3: memref<16x128xbf16, #tpu.memory_space<vmem>>) attributes {dimension_semantics = [#tpu.dimension_semantics<core_parallel>], iteration_bounds = array<i64: 1>, scalar_prefetch = 0 : i64, scratch_operands = 0 : i64, tpu.core_type = #tpu.core_type<tc>, window_params = [{transform_indices = @transform_0, window_bounds = array<i64: 16, 16>}, {pipeline_mode = #tpu.pipeline_mode<synchronous>, transform_indices = @transform_1, window_bounds = array<i64: 336, 128>}, {transform_indices = @transform_2, window_bounds = array<i64: 16, 128>}]} {
    %c0 = arith.constant 0 : index
    %c0_0 = arith.constant 0 : index
    %0 = vector.load %arg1[%c0, %c0_0] : memref<16x16xbf16, #tpu.memory_space<vmem>>, vector<16x16xbf16>
    %c0_1 = arith.constant 0 : index
    %c0_2 = arith.constant 0 : index
    %1 = vector.load %arg2[%c0_1, %c0_2] : memref<336x128xbf16, #tpu.memory_space<vmem>>, vector<16x128xbf16>
    %c16 = arith.constant 16 : index
    %c0_3 = arith.constant 0 : index
    %2 = vector.load %arg2[%c16, %c0_3] : memref<336x128xbf16, #tpu.memory_space<vmem>>, vector<1x128xbf16>
    %c32 = arith.constant 32 : index
    %c0_4 = arith.constant 0 : index
    %3 = vector.load %arg2[%c32, %c0_4] : memref<336x128xbf16, #tpu.memory_space<vmem>>, vector<128x128xbf16>
    %c160 = arith.constant 160 : index
    %c0_5 = arith.constant 0 : index
    %4 = vector.load %arg2[%c160, %c0_5] : memref<336x128xbf16, #tpu.memory_space<vmem>>, vector<1x128xbf16>
    %c176 = arith.constant 176 : index
    %c0_6 = arith.constant 0 : index
    %5 = vector.load %arg2[%c176, %c0_6] : memref<336x128xbf16, #tpu.memory_space<vmem>>, vector<128x128xbf16>
    %c304 = arith.constant 304 : index
    %c0_7 = arith.constant 0 : index
    %6 = vector.load %arg2[%c304, %c0_7] : memref<336x128xbf16, #tpu.memory_space<vmem>>, vector<1x128xbf16>
    %c320 = arith.constant 320 : index
    %c0_8 = arith.constant 0 : index
    %7 = vector.load %arg2[%c320, %c0_8] : memref<336x128xbf16, #tpu.memory_space<vmem>>, vector<1x128xbf16>
    %cst = arith.constant dense<0.000000e+00> : vector<16x128xf32>
    %8 = tpu.matmul %0, %1, %cst {dimension_numbers = #tpu.dot_dimension_numbers<[1], [0], [0], [1], [0, 0, 1, 1], [], []>} : vector<16x16xbf16>, vector<16x128xbf16>, vector<16x128xf32> -> vector<16x128xf32>
    %9 = arith.extf %2 : vector<1x128xbf16> to vector<1x128xf32>
    %10 = vector.broadcast %9 : vector<1x128xf32> to vector<16x128xf32>
    %11 = arith.addf %8, %10 : vector<16x128xf32>
    %cst_9 = arith.constant 0.000000e+00 : f32
    %12 = vector.broadcast %cst_9 : f32 to vector<16x128xf32>
    %13 = arith.maximumf %11, %12 : vector<16x128xf32>
    %14 = arith.truncf %13 : vector<16x128xf32> to vector<16x128xbf16>
    %cst_10 = arith.constant dense<0.000000e+00> : vector<16x128xf32>
    %15 = tpu.matmul %14, %3, %cst_10 {dimension_numbers = #tpu.dot_dimension_numbers<[1], [0], [0], [1], [0, 0, 1, 1], [], []>} : vector<16x128xbf16>, vector<128x128xbf16>, vector<16x128xf32> -> vector<16x128xf32>
    %16 = arith.extf %4 : vector<1x128xbf16> to vector<1x128xf32>
    %17 = vector.broadcast %16 : vector<1x128xf32> to vector<16x128xf32>
    %18 = arith.addf %15, %17 : vector<16x128xf32>
    %cst_11 = arith.constant 0.000000e+00 : f32
    %19 = vector.broadcast %cst_11 : f32 to vector<16x128xf32>
    %20 = arith.maximumf %18, %19 : vector<16x128xf32>
    %21 = arith.truncf %20 : vector<16x128xf32> to vector<16x128xbf16>
    %cst_12 = arith.constant dense<0.000000e+00> : vector<16x128xf32>
    %22 = tpu.matmul %21, %5, %cst_12 {dimension_numbers = #tpu.dot_dimension_numbers<[1], [0], [0], [1], [0, 0, 1, 1], [], []>} : vector<16x128xbf16>, vector<128x128xbf16>, vector<16x128xf32> -> vector<16x128xf32>
    %23 = arith.extf %6 : vector<1x128xbf16> to vector<1x128xf32>
    %24 = vector.broadcast %23 : vector<1x128xf32> to vector<16x128xf32>
    %25 = arith.addf %22, %24 : vector<16x128xf32>
    %cst_13 = arith.constant -2.000000e+01 : f32
    %cst_14 = arith.constant 2.000000e+00 : f32
    %26 = vector.broadcast %cst_13 : f32 to vector<16x128xf32>
    %27 = arith.maximumf %26, %25 : vector<16x128xf32>
    %28 = vector.broadcast %cst_14 : f32 to vector<16x128xf32>
    %29 = arith.minimumf %28, %27 : vector<16x128xf32>
    %30 = math.exp %29 : vector<16x128xf32>
    %cst_15 = arith.constant 5.000000e-01 : bf16
    %31 = vector.broadcast %cst_15 : bf16 to vector<1x128xbf16>
    %32 = arith.cmpf ogt, %7, %31 : vector<1x128xbf16>
    %33 = vector.shape_cast %32 : vector<1x128xi1> to vector<1x128xi1>
    %34 = vector.broadcast %33 : vector<1x128xi1> to vector<16x128xi1>
    %35 = arith.select %34, %25, %30 : vector<16x128xi1>, vector<16x128xf32>
    %36 = arith.truncf %35 : vector<16x128xf32> to vector<16x128xbf16>
    %c0_16 = arith.constant 0 : index
    %c0_17 = arith.constant 0 : index
    %37 = vector.load %arg3[%c0_16, %c0_17] : memref<16x128xbf16, #tpu.memory_space<vmem>>, vector<16x128xbf16>
    tpu.vector_store %arg3[%c0_16, %c0_17], %36 {strides = array<i32>} : memref<16x128xbf16, #tpu.memory_space<vmem>>, vector<16x128xbf16>,
    return
  }
  func.func @transform_0(%arg0: i32) -> (i32, i32) {
    %c0_i32 = arith.constant 0 : i32
    %c0_i32_0 = arith.constant 0 : i32
    return %arg0, %c0_i32 : i32, i32
  }
  func.func @transform_1(%arg0: i32) -> (i32, i32) {
    %c0_i32 = arith.constant 0 : i32
    %c0_i32_0 = arith.constant 0 : i32
    %c0_i32_1 = arith.constant 0 : i32
    return %c0_i32, %c0_i32_0 : i32, i32
  }
  func.func @transform_2(%arg0: i32) -> (i32, i32) {
    %c0_i32 = arith.constant 0 : i32
    %c0_i32_0 = arith.constant 0 : i32
    return %arg0, %c0_i32 : i32, i32
  }
}

</mosaic_0001>

<bundles_post_ra>
// kernel: policy_forward.1
= control target key start
LH: loop header
LB: loop body
LE: loop exit
PB: predicated region body
PF: predicated region fallthrough
CT: control target
= control target key end

     0   :  { %s583_s9 = sld [smem:[#allocation0]]   ;;  %s634_s0 = inlined_call_operand.vmem [shape: bf16[16,16], index: 0, kind: input, shape index: {}]   ;;  %s635_s1 = inlined_call_operand.hbm [shape: bf16[336,128], index: 1, kind: input, shape index: {}]   ;;  %s636_s2 = inlined_call_operand.vmem [shape: bf16[16,128], index: 2, kind: output, shape index: {}]  }
   0x1   :  { %7 = vsyncpa [#allocation3], 0  ;;  %s562_s10 = smov [#allocation2]   ;;  %s538_s14 = scalar_lea.hbm %s635_s1, 2688 }
   0x2   :  { %s21_s11 = sshll.u32 %s562_s10, 4  ;;  %p539_p0 = scmp.ne.s32.totalorder %s635_s1, %s538_s14  ;;  %s22_s11 = int_to_ptr.vmem [resolvable:$true] %s21_s11 }
   0x3   :  { %p542_p1 = scmp.lt.u32.totalorder %s538_s14, %s635_s1 }
   0x5   :  { %p544_p2 = pnand %p542_p1, %p539_p0 }
   0x7   :  { %547 = shalt.err (!%p544_p2)
}
   0x8   :  { %s548_s19 = scalar_lea.vmem %s22_s11, 2688  ;;  %p553_p4 = scmp.lt.s32.totalorder %s22_s11, %s22_s11 }
   0x9   :  { %p549_p3 = scmp.ne.s32.totalorder %s22_s11, %s548_s19  ;;  %p554_p5 = scmp.lt.s32.totalorder %s548_s19, %s548_s19 }
   0xb   :  { %p555_p6 = por %p554_p5, %p553_p4 }
   0xd   :  { %p556_p7 = pnand %p555_p6, %p549_p3 }
   0xf   :  { %559 = shalt.err (!%p556_p7)
}
  0x10   :  { %s563_s20 = smov 64   ;;  %s564_s21 = smov 4  }
  0x11   :  { %27 = dma.hbm_to_vmem [thread:$0]  %s635_s1, 2688, %s22_s11, [#allocation3], %s563_s20, %s563_s20, %s564_s21  }
  0x12   :  { %560 = dma.done.wait [#allocation3], 2688  }
  0x13   :  { %561 = vsyncadd [#allocation3], 4294964608  ;;  %s412_s24 = sshll.u32 %s583_s9, 1  ;;  %v565_v0 = vmov 0.0   ;;  %vm566_vm0 = vmmov 0   ;;  %v516_v1 = vld [vmem:[#allocation2] sm:$0xff]   ;;  %v98_v17 = vlaneseq }
  0x14   :  { %464 = vmatprep.subr.bf16.mxu0 %v565_v0  ;;  %466 = vmatprep.mubr.msk.bf16.mxu0 %vm566_vm0, %v565_v0  ;;  %p42_p8 = scmp.lt.s32.totalorder %s412_s24, 1  ;;  %vm113_vm1 = vcmask 130048   ;;  %v518_v3 = vld [vmem:[#allocation2 + $0x10] sm:$0xff]   ;;  %v519_v4 = vld [vmem:[#allocation2 + $0x18] sm:$0xff]   ;;  %v520_v5 = vld [vmem:[#allocation2 + $0x20] sm:$0xff]   ;;  %v567_v53 = vmov 0  }
  0x15   :  { %470 = vmatprep.subr.bf16.mxu1 %v565_v0  ;;  %486 = vmatprep.mubr.msk.bf16.mxu1 %vm566_vm0, %v565_v0  ;;  %v521_v6 = vld [vmem:[#allocation2 + $0x28] sm:$0xff]   ;;  %v522_v7 = vld [vmem:[#allocation2 + $0x30] sm:$0xff]   ;;  %v523_v8 = vld [vmem:[#allocation2 + $0x38] sm:$0xff]   ;;  %v99_v18 = vshrl.u32 %v98_v17, 7 }
  0x16   :  { %s638_s24 = smov (!%p42_p8, %s412_s24), 1  ;;  %465 = vmatpush3.bf16.msra.mxu0 %v516_v1  ;;  %471 = vmatpush3.bf16.msra.mxu1 %v518_v3  ;;  %v524_v9 = vld [vmem:[#allocation2 + $0x40] sm:$0xff]   ;;  %v525_v10 = vld [vmem:[#allocation2 + $0x48] sm:$0xff]   ;;  %v526_v11 = vld [vmem:[#allocation2 + $0x58] sm:$0xff]  }
  0x17   :  { %s413_s1 = sshll.u32 %s638_s24, 2  ;;  %490 = vmatprep.subr.bf16.mxu0 %v565_v0  ;;  %472 = vmatprep.subr.bf16.mxu1 %v565_v0  ;;  %v527_v12 = vld [vmem:[#allocation2 + $0x60] sm:$0xff]   ;;  %v528_v13 = vld [vmem:[#allocation2 + $0x68] sm:$0xff]   ;;  %v529_v14 = vld [vmem:[#allocation2 + $0x70] sm:$0xff]   ;;  %v100_v21 = vsub.s32 0, %v99_v18 }
  0x18   :  { %s45_s27 = scalar_lea.vmem %s634_s0, %s413_s1  ;;  %v530_v15 = vld [vmem:[#allocation2 + $0x78] sm:$0xff]   ;;  %v531_v16 = vld [vmem:[#allocation2 + $0x80] sm:$0xff]   ;;  %v61_v19 = vld [vmem:[#allocation2 + $0x8] sm:$0x1]  ;;  %s51_s29 = scalar_lea.vmem %s636_s2, %s413_s1 }
  0x19   :  { %v517_v2 = vld [vmem:[%s45_s27] sm:$0xff]   ;;  %v97_v20 = vunpack.c.l.bf16 %v61_v19  ;;  %v532_v32 = vld [vmem:[#allocation2 + $0x88] sm:$0xff]   ;;  %v533_v33 = vld [vmem:[#allocation2 + $0x90] sm:$0xff]  }
  0x1a   :  { %467 = vmatmul.mubr.msk.bf16.vlgmr.msra.gmra.mrb[0].mxu0 %vm113_vm1, %v517_v2  ;;  %473 = vmatpush3.bf16.msra.mxu1 %v519_v4  ;;  %v78_v34 = vld [vmem:[#allocation2 + $0x50] sm:$0x1]  ;;  %v95_v46 = vld [vmem:[#allocation2 + $0x98] sm:$0x1]  ;;  %v96_v48 = vld [vmem:[#allocation2 + $0xa0] sm:$0x1] }
  0x1b   :  { %506 = vmatprep.mubr.msk.bf16.mxu0 %vm566_vm0, %v565_v0  ;;  %474 = vmatprep.subr.bf16.mxu1 %v565_v0  ;;  %v101_v22 = vrot.slane %v97_v20, %v100_v21  ;;  %v161_v35 = vunpack.c.l.bf16 %v78_v34  ;;  %v258_v47 = vunpack.c.l.bf16 %v95_v46  ;;  %vm360_vm2 = vcmp.gt.bf16.partialorder %v96_v48, 1056980736 }
  0x1c   :  { %491 = vmatpush3.bf16.msra.mxu0 %v526_v11  ;;  %v361_v54 = vsel %vm360_vm2, 65537, %v567_v53 }
  0x1d   :  { %492 = vmatprep.subr.bf16.mxu0 %v565_v0  ;;  %v165_v36 = vrot.slane %v161_v35, %v100_v21  ;;  %v262_v49 = vrot.slane %v258_v47, %v100_v21  ;;  %v362_v60 = vunpack.c.l.b16 %v361_v54 }
  0x1e   :  { %475 = vmatpush3.bf16.msra.mxu1 %v520_v5 }
  0x1f   :  { %476 = vmatprep.subr.bf16.mxu1 %v565_v0  ;;  %vm363_vm3 = vcmp.ne.s32.totalorder %v362_v60, 0 }
  0x20   :  { %493 = vmatpush3.bf16.msra.mxu0 %v527_v12  ;;  %v364_v1 = vsel %vm363_vm3, 1, %v567_v53 }
  0x21   :  { %494 = vmatprep.subr.bf16.mxu0 %v565_v0  ;;  %v368_v2 = vrot.slane %v364_v1, %v100_v21 }
  0x22   :  { %477 = vmatpush3.bf16.msra.mxu1 %v521_v6 }
  0x23   :  { %478 = vmatprep.subr.bf16.mxu1 %v565_v0  ;;  %vm369_vm4 = vcmp.eq.s32.totalorder %v368_v2, 1 }
  0x24   :  { %495 = vmatpush3.bf16.msra.mxu0 %v528_v13 }
  0x25   :  { %496 = vmatprep.subr.bf16.mxu0 %v565_v0 }
  0x26   :  { %479 = vmatpush3.bf16.msra.mxu1 %v522_v7 }
  0x27   :  { %480 = vmatprep.subr.bf16.mxu1 %v565_v0 }
  0x28   :  { %497 = vmatpush3.bf16.msra.mxu0 %v529_v14 }
  0x29   :  { %498 = vmatprep.subr.bf16.mxu0 %v565_v0 }
  0x2a   :  { %481 = vmatpush3.bf16.msra.mxu1 %v523_v8 }
  0x2b   :  { %482 = vmatprep.subr.bf16.mxu1 %v565_v0 }
  0x2c   :  { %499 = vmatpush3.bf16.msra.mxu0 %v530_v15 }
  0x2d   :  { %500 = vmatprep.subr.bf16.mxu0 %v565_v0 }
  0x2e   :  { %483 = vmatpush3.bf16.msra.mxu1 %v524_v9 }
  0x2f   :  { %484 = vmatprep.subr.bf16.mxu1 %v565_v0 }
  0x30   :  { %501 = vmatpush3.bf16.msra.mxu0 %v531_v16 }
  0x31   :  { %502 = vmatprep.subr.bf16.mxu0 %v565_v0 }
  0x32   :  { %485 = vmatpush3.bf16.msra.mxu1 %v525_v10 }
  0x34   :  { %503 = vmatpush3.bf16.msra.mxu0 %v532_v32 }
  0x35   :  { %504 = vmatprep.subr.bf16.mxu0 %v565_v0 }
  0x38   :  { %505 = vmatpush3.bf16.msra.mxu0 %v533_v33 }
  0xed   :  { %v151_v23 = vpop.f32.mrb[0].mxu0 }
  0xee   :  { %v152_v24 = vadd.f32 %v151_v23, %v101_v22  ;;  %v468_v25 = vpop.f32.mrb[1].mxu0 }
  0xef   :  { %v154_v26 = vpop.f32.mrb[2].mxu0 }
  0xf0   :  { %v155_v27 = vadd.f32 %v154_v26, %v101_v22  ;;  %v469_v28 = vpop.f32.mrb[3].mxu0  ;;  %v158_v29 = vmax.f32 %v152_v24, 0.0 }
  0xf2   :  { %v159_v30 = vmax.f32 %v155_v27, 0.0 }
  0xf4   :  { %v160_v31 = vpack.c.bf16 %v159_v30, %v158_v29 }
  0xf6   :  { %487 = vmatmul.mubr.bf16.vlgmr.msra.gmra.mrb[0].mxu1 %v160_v31 }
 0x1c9   :  { %v248_v37 = vpop.f32.mrb[0].mxu1 }
 0x1ca   :  { %v249_v38 = vadd.f32 %v248_v37, %v165_v36  ;;  %v488_v39 = vpop.f32.mrb[1].mxu1 }
 0x1cb   :  { %v251_v40 = vpop.f32.mrb[2].mxu1 }
 0x1cc   :  { %v252_v41 = vadd.f32 %v251_v40, %v165_v36  ;;  %v489_v42 = vpop.f32.mrb[3].mxu1  ;;  %v255_v43 = vmax.f32 %v249_v38, 0.0 }
 0x1ce   :  { %v256_v44 = vmax.f32 %v252_v41, 0.0 }
 0x1d0   :  { %v257_v45 = vpack.c.bf16 %v256_v44, %v255_v43 }
 0x1d2   :  { %507 = vmatmul.mubr.bf16.vlgmr.msra.gmra.mrb[4].mxu0 %v257_v45 }
 0x2a5   :  { %v345_v50 = vpop.f32.mrb[4].mxu0 }
 0x2a6   :  { %v346_v51 = vadd.f32 %v345_v50, %v262_v49  ;;  %v508_v52 = vpop.f32.mrb[5].mxu0 }
 0x2a7   :  { %v348_v55 = vpop.f32.mrb[6].mxu0 }
 0x2a8   :  { %v352_v56 = vmax.f32 %v346_v51, -20.0  ;;  %v349_v57 = vadd.f32 %v348_v55, %v262_v49  ;;  %v509_v58 = vpop.f32.mrb[7].mxu0 }
 0x2aa   :  { %v354_v59 = vmin.f32 %v352_v56, 2.0  ;;  %v353_v61 = vmax.f32 %v349_v57, -20.0 }
 0x2ac   :  { %v356_v62 = vmul.f32 1.442695, %v354_v59  ;;  %v355_v63 = vmin.f32 %v353_v61, 2.0 }
 0x2ae   :  { %534 = vpow2.f32 %v356_v62  ;;  %v358_v0 = vmul.f32 1.442695, %v355_v63 }
 0x2b0   :  { %536 = vpow2.f32 %v358_v0 }
 0x2b8   :  { %v535_v3 = vpop.eup %534 }
 0x2b9   :  { %v370_v5 = vsel %vm369_vm4, %v346_v51, %v535_v3 }
 0x2ba   :  { %v537_v4 = vpop.eup %536 }
 0x2bb   :  { %v371_v6 = vsel %vm369_vm4, %v349_v57, %v537_v4 }
 0x2bc   :  { %v442_v7 = vpack.c.bf16 %v371_v6, %v370_v5 }
 0x2be   :  { %443 = vst [vmem:[%s51_s29] sm:$0xff] %v442_v7  }
 0x2bf   :  { %397 = vsyncpa [#allocation3], 1 }

</bundles_post_ra>
